<compile_context>
chip_gen: v5e
topology: v5e:2x2
jax: 0.10.0
libtpu: 0.0.40
codegen_flags: <defaults>
</compile_context>

<pallas_src>
import math
from functools import partial

import jax
import jax.numpy as jnp
from jax import lax
from jax.experimental import pallas as pl
from jax.experimental.pallas import tpu as pltpu


def _round_up(x, m):
    return ((x + m - 1) // m) * m


_LANE = 128
_SUBLANE = {1: 32, 2: 16, 4: 8}        # min sublane block multiple per elem size
_TARGET_TILE_BYTES = 4 << 20           # ~4 MiB of indices per grid step
_TARGET_TB = 256                       # target batch-tile rows
_MAX_TS = 128 * 128                    # cap site tile (bounds the chunk unroll)
_VMEM_LIMIT = 32 << 20                 # scoped VMEM budget (safe on v5e/v6e/v7x)


# ------------------------------ Pallas kernel ------------------------------ #

def _make_onsite_kernel(order, tb, ts, s_total):
    """Kernel for one (batch-tile, site-tile) block.

    table_ref: SMEM f32[order]    strength-scaled group value table
    x_ref:     VMEM int[tb, ts]   group-element indices (partial tiles allowed)
    o_ref:     VMEM f32[tb, 128]  lane-partial energies, accumulated over site tiles
    """
    n_chunks = ts // _LANE
    need_site_mask = (s_total % ts) != 0   # only the ragged last site tile needs it

    def kernel(table_ref, x_ref, o_ref):
        j = pl.program_id(1)

        # Hoisted broadcasts of the tiny SMEM table (JAX does not CSE these).
        tvals = [jnp.full((tb, _LANE), table_ref[g], jnp.float32)
                 for g in range(order)]
        if need_site_mask:
            lane = lax.broadcasted_iota(jnp.int32, (tb, _LANE), 1)
            tile_base = j * ts

        # Fold the ts sites down to 128 lane-partials with vreg-aligned static
        # slices + pure VPU adds (no cross-lane XLU reduce in the hot loop).
        acc = jnp.zeros((tb, _LANE), jnp.float32)
        for c in range(n_chunks):
            xc = x_ref[:, c * _LANE:(c + 1) * _LANE]
            if xc.dtype != jnp.int32:
                xc = xc.astype(jnp.int32)          # in-register upcast only
            # Group-value lookup: nested compare/select chain; the last group
            # element is the "everything else" bucket (order-1 compares).
            v = tvals[order - 1]
            for g in range(order - 1):
                v = jnp.where(xc == g, tvals[g], v)
            if need_site_mask:
                v = jnp.where(tile_base + (c * _LANE) + lane < s_total,
                              v, jnp.float32(0.0))
            acc = acc + v

        # Output block is resident across the site (reduction) axis.
        @pl.when(j == 0)
        def _():
            o_ref[...] = acc

        @pl.when(j > 0)
        def _():
            o_ref[...] = o_ref[...] + acc

    return kernel


@jax.jit
def onsite_energy(x_flat, val_table, strength):
    """out[b] = sum_s strength * val_table[x_flat[b, s]]  (Pallas TPU kernel)."""
    B, S = x_flat.shape
    order = int(val_table.shape[0])

    # Keep narrow integer indices narrow (the kernel is HBM-bandwidth-bound);
    # only non-integer / wide dtypes are normalized to int32.
    if (not jnp.issubdtype(x_flat.dtype, jnp.integer)) or x_flat.dtype.itemsize > 4:
        x_flat = x_flat.astype(jnp.int32)
    itemsize = x_flat.dtype.itemsize
    sub = _SUBLANE[itemsize]

    # Fold the scalar strength into the (order,)-sized table; identical to
    # torch's elementwise (val * strength) followed by sum, hoisted off the
    # per-site path.
    table = val_table.astype(jnp.float32) * jnp.asarray(strength, jnp.float32)

    # ---------------- tile selection (no host-side padding) ---------------- #
    b_ceil = _round_up(B, sub)
    s_ceil = _round_up(S, _LANE)

    tb = _round_up(min(_TARGET_TB, b_ceil), sub)
    # v7x has 2 TensorCores: keep >= 2 tiles on the "parallel" batch axis
    # whenever the batch is large enough to split.
    if b_ceil >= 2 * sub and -(-b_ceil // tb) < 2:
        tb = _round_up(b_ceil // 2, sub)

    ts = _TARGET_TILE_BYTES // (tb * itemsize)
    ts = max(_LANE, (ts // _LANE) * _LANE)
    ts = min(ts, s_ceil, _MAX_TS)

    grid_b = -(-B // tb)
    grid_s = -(-S // ts)

    kernel = _make_onsite_kernel(order, tb, ts, S)

    out = pl.pallas_call(
        kernel,
        out_shape=jax.ShapeDtypeStruct((grid_b * tb, _LANE), jnp.float32),
        grid=(grid_b, grid_s),
        in_specs=[
            pl.BlockSpec(memory_space=pltpu.MemorySpace.SMEM),   # value table
            pl.BlockSpec((tb, ts), lambda i, j: (i, j)),          # index tile
        ],
        # Same output block across the site (reduction) axis -> VMEM-resident
        # lane-partial accumulator, written back to HBM once per batch tile.
        out_specs=pl.BlockSpec((tb, _LANE), lambda i, j: (i, 0)),
        compiler_params=pltpu.CompilerParams(
            dimension_semantics=("parallel", "arbitrary"),
            vmem_limit_bytes=_VMEM_LIMIT,
        ),
        cost_estimate=pl.CostEstimate(
            flops=B * S * (order + 1),
            transcendentals=0,
            bytes_accessed=B * S * itemsize + grid_b * tb * _LANE * 4 + order * 4,
        ),
    )(table, x_flat)

    # Finish the tiny 128-lane partial sums in JAX and drop padded batch rows.
    return out[:B].sum(axis=-1)


# ----------------------- minimal Group / Lattice glue ----------------------- #

class Group:
    """Minimal JAX port of the reference Group (enough for OnSite)."""

    def __init__(self, mul_table):
        self.mul_table = jnp.asarray(mul_table, jnp.int32)
        self.order = int(self.mul_table.shape[0])
        gs, ginvs = jnp.nonzero(self.mul_table == 0)
        self.inv_table = jnp.take(ginvs, gs)     # torch.gather(ginvs, 0, gs)
        self.val_table = None

    def default_val_table(self):
        if self.val_table is None:
            self.val_table = jnp.zeros((self.order,), jnp.float32).at[0].set(1.0)
        return self.val_table

    def val(self, x, val_table=None):
        # Pure-JAX reference of group.val (used for checking only).
        table = self.default_val_table() if val_table is None else val_table
        return jnp.take(table, x)


class Lattice:
    """Minimal lattice holder: OnSite.forward only uses `.dimension`."""
    # TODO(synk): the reference Lattice's causal-graph construction (recursive
    # tree partition + networkx LCA) is not ported; it is unused by OnSite.

    def __init__(self, size, dimension):
        self.size = size
        self.dimension = dimension
        self.shape = [size] * dimension
        self.sites = size ** dimension


class OnSite:
    """JAX/Pallas port of OnSite (on-site energy term)."""

    def __init__(self, val_table=None):
        self.val_table = None if val_table is None else jnp.asarray(val_table, jnp.float32)
        self.strength = 1.0
        self.group = None
        self.lattice = None

    def __mul__(self, other):
        self.strength *= other
        return self

    def __rmul__(self, other):
        return self * other

    def __neg__(self):
        return self * -1

    def on(self, group=None, lattice=None):
        self.group = group
        self.lattice = lattice
        return self

    def __call__(self, x):
        if self.group is None:
            raise RuntimeError("A group structure has not been linked; call .on(group=...).")
        if self.lattice is None:
            raise RuntimeError("A lattice system has not been linked; call .on(lattice=...).")
        table = self.group.default_val_table() if self.val_table is None else self.val_table
        if int(table.shape[0]) != self.group.order:
            raise ValueError("Group function value table must match the group order, "
                             f"expect {self.group.order} got {int(table.shape[0])}.")
        d = self.lattice.dimension
        x_arr = jnp.asarray(x)
        if not jnp.issubdtype(x_arr.dtype, jnp.integer):
            x_arr = x_arr.astype(jnp.int32)
        lead_shape = x_arr.shape[:-d]
        S = 1
        for s in x_arr.shape[-d:]:
            S *= int(s)
        x_flat = x_arr.reshape((-1, S))
        energy = onsite_energy(x_flat, table, self.strength)
        return energy.reshape(lead_shape)


# ----------------------------------- main ----------------------------------- #

if __name__ == "__main__":
    size, dimension, batch = 16, 2, 2          # 16x16 lattice, batch of 2
    strength = 2.5

    group = Group(jnp.array([[0, 1], [1, 0]]))  # Z2 group
    lattice = Lattice(size, dimension)

    term = OnSite()                             # default val_table = [1, 0]
    term = term * strength
    term.on(group=group, lattice=lattice)

    key = jax.random.PRNGKey(0)
    x = jax.random.randint(key, (batch, size, size), 0, group.order, dtype=jnp.int32)

    out = term(x)
    out = jax.block_until_ready(out)
    assert out.shape == (batch,)

    # Pure-JAX reference with identical semantics (gather -> scale -> spatial sum).
    ref = (group.val(x) * strength).sum(axis=(-2, -1))
    assert jnp.allclose(out, ref, atol=1e-5, rtol=1e-5), (out, ref)

    print("KERNEL_OK")
</pallas_src>

<mosaic_0001>
module attributes {stable_mosaic.version = 11 : i64} {
  func.func @kernel(%arg0: i32, %arg1: i32, %arg2: memref<2xf32, #tpu.memory_space<smem>>, %arg3: memref<8x256xi32, #tpu.memory_space<vmem>>, %arg4: memref<8x128xf32, #tpu.memory_space<vmem>>) attributes {dimension_semantics = [#tpu.dimension_semantics<parallel>, #tpu.dimension_semantics<arbitrary>], iteration_bounds = array<i64: 1, 1>, scalar_prefetch = 0 : i64, scratch_operands = 0 : i64, tpu.core_type = #tpu.core_type<tc>, window_params = [{transform_indices = @transform_0, window_bounds = array<i64: 2>}, {transform_indices = @transform_1, window_bounds = array<i64: 8, 256>}, {transform_indices = @transform_2, window_bounds = array<i64: 8, 128>}]} {
    %c0 = arith.constant 0 : index
    %0 = memref.load %arg2[%c0] : memref<2xf32, #tpu.memory_space<smem>>
    %1 = vector.broadcast %0 : f32 to vector<8x128xf32>
    %c1 = arith.constant 1 : index
    %2 = memref.load %arg2[%c1] : memref<2xf32, #tpu.memory_space<smem>>
    %3 = vector.broadcast %2 : f32 to vector<8x128xf32>
    %cst = arith.constant 0.000000e+00 : f32
    %4 = vector.broadcast %cst : f32 to vector<8x128xf32>
    %c0_0 = arith.constant 0 : index
    %c0_1 = arith.constant 0 : index
    %5 = vector.load %arg3[%c0_0, %c0_1] : memref<8x256xi32, #tpu.memory_space<vmem>>, vector<8x128xi32>
    %c0_i32 = arith.constant 0 : i32
    %6 = vector.broadcast %c0_i32 : i32 to vector<8x128xi32>
    %7 = arith.cmpi eq, %5, %6 : vector<8x128xi32>
    %8 = arith.select %7, %1, %3 : vector<8x128xi1>, vector<8x128xf32>
    %9 = arith.addf %4, %8 : vector<8x128xf32>
    %c0_2 = arith.constant 0 : index
    %c128 = arith.constant 128 : index
    %10 = vector.load %arg3[%c0_2, %c128] : memref<8x256xi32, #tpu.memory_space<vmem>>, vector<8x128xi32>
    %c0_i32_3 = arith.constant 0 : i32
    %11 = vector.broadcast %c0_i32_3 : i32 to vector<8x128xi32>
    %12 = arith.cmpi eq, %10, %11 : vector<8x128xi32>
    %13 = arith.select %12, %1, %3 : vector<8x128xi1>, vector<8x128xf32>
    %14 = arith.addf %9, %13 : vector<8x128xf32>
    %c0_i32_4 = arith.constant 0 : i32
    %15 = arith.cmpi eq, %arg1, %c0_i32_4 : i32
    %16 = arith.extui %15 : i1 to i32
    %c0_i32_5 = arith.constant 0 : i32
    %17 = arith.cmpi ne, %16, %c0_i32_5 : i32
    scf.if %17 {
      %c0_8 = arith.constant 0 : index
      %c0_9 = arith.constant 0 : index
      %21 = vector.load %arg4[%c0_8, %c0_9] : memref<8x128xf32, #tpu.memory_space<vmem>>, vector<8x128xf32>
      tpu.vector_store %arg4[%c0_8, %c0_9], %14 {strides = array<i32>} : memref<8x128xf32, #tpu.memory_space<vmem>>, vector<8x128xf32>,
    } else {
    }
    %c0_i32_6 = arith.constant 0 : i32
    %18 = arith.cmpi sgt, %arg1, %c0_i32_6 : i32
    %19 = arith.extui %18 : i1 to i32
    %c0_i32_7 = arith.constant 0 : i32
    %20 = arith.cmpi ne, %19, %c0_i32_7 : i32
    scf.if %20 {
      %c0_8 = arith.constant 0 : index
      %c0_9 = arith.constant 0 : index
      %21 = vector.load %arg4[%c0_8, %c0_9] : memref<8x128xf32, #tpu.memory_space<vmem>>, vector<8x128xf32>
      %22 = arith.addf %21, %14 : vector<8x128xf32>
      %c0_10 = arith.constant 0 : index
      %c0_11 = arith.constant 0 : index
      %23 = vector.load %arg4[%c0_10, %c0_11] : memref<8x128xf32, #tpu.memory_space<vmem>>, vector<8x128xf32>
      tpu.vector_store %arg4[%c0_10, %c0_11], %22 {strides = array<i32>} : memref<8x128xf32, #tpu.memory_space<vmem>>, vector<8x128xf32>,
    } else {
    }
    return
  }
  func.func @transform_0(%arg0: i32, %arg1: i32) -> i32 {
    %c0_i32 = arith.constant 0 : i32
    %c0_i32_0 = arith.constant 0 : i32
    return %c0_i32 : i32
  }
  func.func @transform_1(%arg0: i32, %arg1: i32) -> (i32, i32) {
    %c0_i32 = arith.constant 0 : i32
    return %arg0, %arg1 : i32, i32
  }
  func.func @transform_2(%arg0: i32, %arg1: i32) -> (i32, i32) {
    %c0_i32 = arith.constant 0 : i32
    %c0_i32_0 = arith.constant 0 : i32
    return %arg0, %c0_i32 : i32, i32
  }
}

</mosaic_0001>

<bundles_post_ra>
// kernel: onsite_energy.1
= control target key start
LH: loop header
LB: loop body
LE: loop exit
PB: predicated region body
PF: predicated region fallthrough
CT: control target
= control target key end

     0   :  { %7 = vsyncpa [#allocation3], 0  ;;  %s119_s12 = smov [#allocation2]   ;;  %s165_s0 = inlined_call_operand.vmem [shape: f32[2], index: 0, kind: input, shape index: {}]   ;;  %s166_s1 = inlined_call_operand.vmem [shape: s32[2,256], index: 1, kind: input, shape index: {}]   ;;  %s167_s2 = inlined_call_operand.vmem [shape: f32[8,128], index: 2, kind: output, shape index: {}]  }
   0x1   :  { %s13_s11 = sshll.u32 %s165_s0, 4  ;;  %s14_s11 = int_to_ptr.vmem [resolvable:$true] %s13_s11 }
   0x2   :  { %16 = dma.vmem_to_smem %s14_s11, 16, %s119_s12, [#allocation3]  }
   0x3   :  { %117 = dma.done.wait [#allocation3], 16  }
   0x4   :  { %118 = vsyncadd [#allocation3], 4294967280 }
   0x5   :  { %23 = sfence }
   0x6   :  { %s24_s13 = sld [smem:[#allocation2]]  ;;  %v28_v0 = vld [vmem:[%s166_s1] sm:$0x3]  ;;  %v44_v1 = vld [vmem:[%s166_s1 + $0x2] sm:$0x3] }
   0x7   :  { %s103_s14 = sld [smem:[#allocation2 + $0x1]]  ;;  %v29_v2 = vld [vmem:[%s166_s1 + $0x4] sm:$0x3]  ;;  %v45_v3 = vld [vmem:[%s166_s1 + $0x6] sm:$0x3]  ;;  %vm32_vm0 = vcmp.eq.s32.totalorder %v28_v0, 0 }
   0x8   :  { %v30_v4 = vld [vmem:[%s166_s1 + $0x8] sm:$0x3]  ;;  %v46_v5 = vld [vmem:[%s166_s1 + $0xa] sm:$0x3]  ;;  %v31_v6 = vld [vmem:[%s166_s1 + $0xc] sm:$0x3] }
   0x9   :  { %v47_v7 = vld [vmem:[%s166_s1 + $0xe] sm:$0x3]  ;;  %vm48_vm1 = vcmp.eq.s32.totalorder %v44_v1, 0  ;;  %vm33_vm2 = vcmp.eq.s32.totalorder %v29_v2, 0  ;;  %vm49_vm3 = vcmp.eq.s32.totalorder %v45_v3, 0  ;;  %vm34_vm4 = vcmp.eq.s32.totalorder %v30_v4, 0 }
   0xa   :  { %vm50_vm5 = vcmp.eq.s32.totalorder %v46_v5, 0  ;;  %vm35_vm6 = vcmp.eq.s32.totalorder %v31_v6, 0  ;;  %vm51_vm7 = vcmp.eq.s32.totalorder %v47_v7, 0 }
   0xc   :  { %v25_v8 = vstv %s24_s13 }
   0xd   :  { %v27_v9 = vstv %s103_s14 }
   0xe   :  { %v36_v10 = vsel %vm32_vm0, %v25_v8, %v27_v9  ;;  %v52_v11 = vsel %vm48_vm1, %v25_v8, %v27_v9  ;;  %v37_v12 = vsel %vm33_vm2, %v25_v8, %v27_v9  ;;  %v53_v13 = vsel %vm49_vm3, %v25_v8, %v27_v9 }
   0xf   :  { %v56_v14 = vadd.f32 %v52_v11, %v36_v10  ;;  %v57_v15 = vadd.f32 %v53_v13, %v37_v12  ;;  %v38_v16 = vsel %vm34_vm4, %v25_v8, %v27_v9  ;;  %v54_v17 = vsel %vm50_vm5, %v25_v8, %v27_v9 }
  0x10   :  { %v58_v18 = vadd.f32 %v54_v17, %v38_v16  ;;  %v39_v19 = vsel %vm35_vm6, %v25_v8, %v27_v9  ;;  %v55_v20 = vsel %vm51_vm7, %v25_v8, %v27_v9 }
  0x11   :  { %68 = vst [vmem:[#allocation1] ss:$4 sm:$0xff] %v56_v14  ;;  %v59_v21 = vadd.f32 %v55_v20, %v39_v19 }
  0x12   :  { %70 = vst [vmem:[#allocation1 + $0x1] ss:$4 sm:$0xff] %v57_v15 }
  0x13   :  { %72 = vst [vmem:[#allocation1 + $0x2] ss:$4 sm:$0xff] %v58_v18 }
  0x14   :  { %74 = vst [vmem:[#allocation1 + $0x3] ss:$4 sm:$0xff] %v59_v21 }
  0x1b   :  { %v75_v22 = vld.sshfl [vmem:[#allocation1] sm:$0xff pattern:$0x73625140] }
  0x1c   :  { %77 = vst [vmem:[%s167_s2] sm:$0xff] %v75_v22 }
  0x1d   :  { %102 = vsyncpa [#allocation3], 1 }

</bundles_post_ra>
